<compile_context>
chip_gen: v5e
topology: v5e:2x2
jax: 0.10.0
libtpu: 0.0.40
codegen_flags: <defaults>
</compile_context>

<pallas_src>
import functools

import jax
import jax.numpy as jnp
from jax.experimental import pallas as pl
from jax.experimental.pallas import tpu as pltpu


def _round_up(x, m):
    return (x + m - 1) // m * m


def pack_grouped_conv_weight(w, *, groups, cin, cin_pad, cout_pad):
    """Pack a PyTorch-layout grouped conv weight (Cout, Cin//G, KH, KW) into a
    dense block-diagonal, tap-fused matrix of shape (cout_pad, KH*KW*cin_pad).

    Column t*cin_pad + ci multiplies input channel ci at tap t = kh*KW + kw.
    Call once per weight (hoisted out of the per-call path when reused).
    """
    Cout, Cin_g, KH, KW = w.shape
    G = groups
    assert cin == G * Cin_g and Cout % G == 0
    Og = Cout // G
    T = KH * KW
    # (T, Cout, Cin_g) with t = kh*KW + kw
    w_taps = jnp.transpose(w, (2, 3, 0, 1)).reshape(T, Cout, Cin_g)
    # Block-diagonal expansion over (PyTorch-contiguous) groups: (T, Cout, Cin)
    grp_out = jnp.arange(Cout) // Og
    grp_in = jnp.arange(cin) // Cin_g
    mask = (grp_out[:, None] == grp_in[None, :]).astype(w.dtype)
    w_bd = jnp.tile(w_taps, (1, 1, G)) * mask[None, :, :]
    # Zero-pad channels to tile-friendly sizes (padded rows/cols contribute 0).
    w_bd = jnp.pad(w_bd, ((0, 0), (0, cout_pad - Cout), (0, cin_pad - cin)))
    # Fuse taps into the contraction dim: (cout_pad, T*cin_pad)
    return jnp.transpose(w_bd, (1, 0, 2)).reshape(cout_pad, T * cin_pad)


def _make_kernel(N, Cin, Cin_pad, HW, HWp, shifts):
    L = N * HWp                      # batch folded into the lane dim

    def kernel(x_ref, w_ref, o_ref, xs_ref, stk_ref):
        # x_ref  : (N, Cin, HW)        unpadded flattened input
        # w_ref  : (Cout_pad, K)       tap-fused block-diagonal grouped weights
        # o_ref  : (N, Cout_pad, HW)   tanh(conv) on the full HxW grid
        # xs_ref : (Cin_pad, L + 128)  zero-padded, batch-folded activations
        # stk_ref: (K, L)              tap-stacked matmul RHS
        xs_ref[...] = jnp.zeros_like(xs_ref)
        for n in range(N):
            # Each batch owns a 128-aligned lane stripe of width HWp.
            xs_ref[0:Cin, n * HWp:n * HWp + HW] = x_ref[n]
        xall = xs_ref[...]                                   # (Cin_pad, L+128)
        for t, s in enumerate(shifts):
            # Shifted view of the whole batch-folded activation; bleed across a
            # stripe boundary only hits columns >= HW in that stripe (invalid
            # output positions, sliced away on the host).
            stk_ref[t * Cin_pad:(t + 1) * Cin_pad, :] = xall[:, s:s + L]
        # Single MXU matmul over the fused contraction dim K = T*Cin_pad.
        acc = jnp.dot(w_ref[...], stk_ref[...],
                      preferred_element_type=jnp.float32)    # (Cout_pad, L)
        for n in range(N):
            o_ref[n] = jnp.tanh(acc[:, n * HWp:n * HWp + HW]).astype(o_ref.dtype)

    return kernel


@functools.partial(jax.jit, static_argnames=("cout", "kh", "kw"))
def grouped_conv2d_tanh(x, w_packed, *, cout, kh, kw):
    """tanh(conv2d(x, w, padding=0, groups=G, bias=None)) with pre-packed w."""
    N, Cin, H, W = x.shape
    Ho, Wo = H - kh + 1, W - kw + 1
    HW = H * W
    Cin_pad = _round_up(Cin, 8)
    Cout_pad, K = w_packed.shape
    T = kh * kw
    assert K == T * Cin_pad and Cout_pad >= cout

    # Stripe width: multiple of 128 with room for the largest tap shift so
    # every shifted slice stays in bounds (correctness depends on this pad).
    max_shift = (kh - 1) * W + (kw - 1)
    HWp = _round_up(HW + max_shift, 128)
    assert HWp >= HW + max_shift
    L = N * HWp
    shifts = tuple(r * W + c for r in range(kh) for c in range(kw))

    out = pl.pallas_call(
        _make_kernel(N, Cin, Cin_pad, HW, HWp, shifts),
        out_shape=jax.ShapeDtypeStruct((N, Cout_pad, HW), x.dtype),
        in_specs=[
            pl.BlockSpec(memory_space=pltpu.MemorySpace.VMEM),
            pl.BlockSpec(memory_space=pltpu.MemorySpace.VMEM),
        ],
        out_specs=pl.BlockSpec(memory_space=pltpu.MemorySpace.VMEM),
        scratch_shapes=[
            pltpu.VMEM((Cin_pad, L + 128), jnp.float32),
            pltpu.VMEM((K, L), jnp.float32),
        ],
    )(x.reshape(N, Cin, HW), w_packed)

    # Drop padded channels and the invalid (oh >= Ho, ow >= Wo) positions.
    return out[:, :cout, :].reshape(N, cout, H, W)[:, :, :Ho, :Wo]


if __name__ == "__main__":
    key = jax.random.PRNGKey(0)
    kx, kw_key = jax.random.split(key)

    # Small shapes consistent with the module: Cin=10, Cout=50, k=2, groups=2.
    N, Cin, H, W = 2, 10, 16, 16
    Cout, G, KH, KW = 50, 2, 2, 2

    x = jax.random.normal(kx, (N, Cin, H, W), dtype=jnp.float32)
    # Deterministic PyTorch-like uniform init, bound = 1/sqrt(fan_in)
    fan_in = (Cin // G) * KH * KW
    bound = 1.0 / (fan_in ** 0.5)
    w = jax.random.uniform(kw_key, (Cout, Cin // G, KH, KW),
                           minval=-bound, maxval=bound, dtype=jnp.float32)

    # Pack weights once (hoisted out of the per-call path).
    Cin_pad = _round_up(Cin, 8)
    Cout_pad = _round_up(Cout, 8)
    w_packed = pack_grouped_conv_weight(w, groups=G, cin=Cin,
                                        cin_pad=Cin_pad, cout_pad=Cout_pad)

    y = grouped_conv2d_tanh(x, w_packed, cout=Cout, kh=KH, kw=KW)
    y = jax.block_until_ready(y)

    # Reference: XLA grouped conv + tanh
    y_ref = jnp.tanh(
        jax.lax.conv_general_dilated(
            x, w, window_strides=(1, 1), padding="VALID",
            dimension_numbers=("NCHW", "OIHW", "NCHW"),
            feature_group_count=G,
        )
    )
    assert y.shape == (N, Cout, H - KH + 1, W - KW + 1)
    assert jnp.allclose(y, y_ref, atol=1e-5, rtol=1e-5)

    print("KERNEL_OK")
</pallas_src>

<mosaic_0001>
module attributes {stable_mosaic.version = 11 : i64} {
  func.func @kernel(%arg0: memref<2x10x256xf32, #tpu.memory_space<vmem>>, %arg1: memref<56x64xf32, #tpu.memory_space<vmem>>, %arg2: memref<2x56x256xf32, #tpu.memory_space<vmem>>, %arg3: memref<16x896xf32, #tpu.memory_space<vmem>>, %arg4: memref<64x768xf32, #tpu.memory_space<vmem>>) attributes {dimension_semantics = [], scalar_prefetch = 0 : i64, scratch_operands = 2 : i64, tpu.core_type = #tpu.core_type<tc>} {
    %cst = arith.constant 0.000000e+00 : f32
    %0 = vector.broadcast %cst : f32 to vector<16x896xf32>
    %c0 = arith.constant 0 : index
    %c0_0 = arith.constant 0 : index
    %1 = vector.load %arg3[%c0, %c0_0] : memref<16x896xf32, #tpu.memory_space<vmem>>, vector<16x896xf32>
    tpu.vector_store %arg3[%c0, %c0_0], %0 {strides = array<i32>} : memref<16x896xf32, #tpu.memory_space<vmem>>, vector<16x896xf32>,
    %c0_1 = arith.constant 0 : index
    %c0_2 = arith.constant 0 : index
    %c0_3 = arith.constant 0 : index
    %2 = vector.load %arg0[%c0_1, %c0_2, %c0_3] : memref<2x10x256xf32, #tpu.memory_space<vmem>>, vector<1x10x256xf32>
    %3 = vector.shape_cast %2 : vector<1x10x256xf32> to vector<10x256xf32>
    %c0_4 = arith.constant 0 : index
    %c0_5 = arith.constant 0 : index
    %4 = vector.load %arg3[%c0_4, %c0_5] : memref<16x896xf32, #tpu.memory_space<vmem>>, vector<10x256xf32>
    tpu.vector_store %arg3[%c0_4, %c0_5], %3 {strides = array<i32>} : memref<16x896xf32, #tpu.memory_space<vmem>>, vector<10x256xf32>,
    %c1 = arith.constant 1 : index
    %c0_6 = arith.constant 0 : index
    %c0_7 = arith.constant 0 : index
    %5 = vector.load %arg0[%c1, %c0_6, %c0_7] : memref<2x10x256xf32, #tpu.memory_space<vmem>>, vector<1x10x256xf32>
    %6 = vector.shape_cast %5 : vector<1x10x256xf32> to vector<10x256xf32>
    %c0_8 = arith.constant 0 : index
    %c384 = arith.constant 384 : index
    %7 = vector.load %arg3[%c0_8, %c384] : memref<16x896xf32, #tpu.memory_space<vmem>>, vector<10x256xf32>
    tpu.vector_store %arg3[%c0_8, %c384], %6 {strides = array<i32>} : memref<16x896xf32, #tpu.memory_space<vmem>>, vector<10x256xf32>,
    %c0_9 = arith.constant 0 : index
    %c0_10 = arith.constant 0 : index
    %8 = vector.load %arg3[%c0_9, %c0_10] : memref<16x896xf32, #tpu.memory_space<vmem>>, vector<16x896xf32>
    %9 = vector.extract_strided_slice %8 {offsets = [0, 0], sizes = [16, 768], strides = [1, 1]} : vector<16x896xf32> to vector<16x768xf32>
    %c0_11 = arith.constant 0 : index
    %c0_12 = arith.constant 0 : index
    %10 = vector.load %arg4[%c0_11, %c0_12] : memref<64x768xf32, #tpu.memory_space<vmem>>, vector<16x768xf32>
    tpu.vector_store %arg4[%c0_11, %c0_12], %9 {strides = array<i32>} : memref<64x768xf32, #tpu.memory_space<vmem>>, vector<16x768xf32>,
    %11 = vector.extract_strided_slice %8 {offsets = [0, 1], sizes = [16, 768], strides = [1, 1]} : vector<16x896xf32> to vector<16x768xf32>
    %c16 = arith.constant 16 : index
    %c0_13 = arith.constant 0 : index
    %12 = vector.load %arg4[%c16, %c0_13] : memref<64x768xf32, #tpu.memory_space<vmem>>, vector<16x768xf32>
    tpu.vector_store %arg4[%c16, %c0_13], %11 {strides = array<i32>} : memref<64x768xf32, #tpu.memory_space<vmem>>, vector<16x768xf32>,
    %13 = vector.extract_strided_slice %8 {offsets = [0, 16], sizes = [16, 768], strides = [1, 1]} : vector<16x896xf32> to vector<16x768xf32>
    %c32 = arith.constant 32 : index
    %c0_14 = arith.constant 0 : index
    %14 = vector.load %arg4[%c32, %c0_14] : memref<64x768xf32, #tpu.memory_space<vmem>>, vector<16x768xf32>
    tpu.vector_store %arg4[%c32, %c0_14], %13 {strides = array<i32>} : memref<64x768xf32, #tpu.memory_space<vmem>>, vector<16x768xf32>,
    %15 = vector.extract_strided_slice %8 {offsets = [0, 17], sizes = [16, 768], strides = [1, 1]} : vector<16x896xf32> to vector<16x768xf32>
    %c48 = arith.constant 48 : index
    %c0_15 = arith.constant 0 : index
    %16 = vector.load %arg4[%c48, %c0_15] : memref<64x768xf32, #tpu.memory_space<vmem>>, vector<16x768xf32>
    tpu.vector_store %arg4[%c48, %c0_15], %15 {strides = array<i32>} : memref<64x768xf32, #tpu.memory_space<vmem>>, vector<16x768xf32>,
    %c0_16 = arith.constant 0 : index
    %c0_17 = arith.constant 0 : index
    %17 = vector.load %arg1[%c0_16, %c0_17] : memref<56x64xf32, #tpu.memory_space<vmem>>, vector<56x64xf32>
    %c0_18 = arith.constant 0 : index
    %c0_19 = arith.constant 0 : index
    %18 = vector.load %arg4[%c0_18, %c0_19] : memref<64x768xf32, #tpu.memory_space<vmem>>, vector<64x768xf32>
    %cst_20 = arith.constant dense<0.000000e+00> : vector<56x768xf32>
    %19 = tpu.matmul %17, %18, %cst_20 {dimension_numbers = #tpu.dot_dimension_numbers<[1], [0], [0], [1], [0, 0, 1, 1], [], []>} : vector<56x64xf32>, vector<64x768xf32>, vector<56x768xf32> -> vector<56x768xf32>
    %20 = vector.extract_strided_slice %19 {offsets = [0, 0], sizes = [56, 256], strides = [1, 1]} : vector<56x768xf32> to vector<56x256xf32>
    %21 = math.tanh %20 : vector<56x256xf32>
    %c0_21 = arith.constant 0 : index
    %c0_22 = arith.constant 0 : index
    %c0_23 = arith.constant 0 : index
    %22 = vector.load %arg2[%c0_21, %c0_22, %c0_23] : memref<2x56x256xf32, #tpu.memory_space<vmem>>, vector<1x56x256xf32>
    %23 = vector.shape_cast %22 : vector<1x56x256xf32> to vector<56x256xf32>
    %24 = vector.shape_cast %21 : vector<56x256xf32> to vector<1x56x256xf32>
    tpu.vector_store %arg2[%c0_21, %c0_22, %c0_23], %24 {strides = array<i32>} : memref<2x56x256xf32, #tpu.memory_space<vmem>>, vector<1x56x256xf32>,
    %25 = vector.extract_strided_slice %19 {offsets = [0, 384], sizes = [56, 256], strides = [1, 1]} : vector<56x768xf32> to vector<56x256xf32>
    %26 = math.tanh %25 : vector<56x256xf32>
    %c1_24 = arith.constant 1 : index
    %c0_25 = arith.constant 0 : index
    %c0_26 = arith.constant 0 : index
    %27 = vector.load %arg2[%c1_24, %c0_25, %c0_26] : memref<2x56x256xf32, #tpu.memory_space<vmem>>, vector<1x56x256xf32>
    %28 = vector.shape_cast %27 : vector<1x56x256xf32> to vector<56x256xf32>
    %29 = vector.shape_cast %26 : vector<56x256xf32> to vector<1x56x256xf32>
    tpu.vector_store %arg2[%c1_24, %c0_25, %c0_26], %29 {strides = array<i32>} : memref<2x56x256xf32, #tpu.memory_space<vmem>>, vector<1x56x256xf32>,
    return
  }
}

</mosaic_0001>

<bundles_post_ra>
// kernel: grouped_conv2d_tanh.1
= control target key start
LH: loop header
LB: loop body
LE: loop exit
PB: predicated region body
PF: predicated region fallthrough
CT: control target
= control target key end

     0   :  { %v747_v1 = vmov 0.0   ;;  %s748_s17 = smov 111   ;;  %s749_s18 = smov 112   ;;  %vm240_vm0 = vcmask 908288   ;;  %vm175_vm1 = vcmask 916480   ;;  %vm110_vm2 = vcmask 1039360   ;;  %s991_s0 = inlined_call_operand.vmem [shape: f32[2,10,256], index: 0, kind: input, shape index: {}]   ;;  %s992_s1 = inlined_call_operand.vmem [shape: f32[56,64], index: 1, kind: input, shape index: {}]   ;;  %s993_s2 = inlined_call_operand.vmem [shape: f32[2,56,256], index: 2, kind: output, shape index: {}]  }
   0x1   :  { %v769_v0 = vld [vmem:[%s991_s0 + $0x28] sm:$0xff]  ;;  %21 = vst [vmem:[#allocation2 + $0x10] sm:$0xff] %v747_v1  ;;  %v553_v2 = vld [vmem:[%s991_s0 + $0x30] sm:$0x3]  ;;  %v778_v4 = vld [vmem:[%s991_s0 + $0x20] sm:$0xff]  ;;  %s750_s27 = smov 127  }
   0x2   :  { %v611_v3 = vpack.i.bf16 0.0, %v769_v0  ;;  %22 = vst [vmem:[#allocation2 + $0x38] sm:$0xff] %v747_v1  ;;  %v554_v5 = vld [vmem:[%s991_s0 + $0x38] sm:$0x3]  ;;  %v606_v6 = vpack.i.bf16 %v778_v4, %v747_v1  ;;  %v27_v8 = vld [vmem:[%s991_s0 + $0x10] sm:$0x3] }
   0x3   :  { %40 = vst [vmem:[#allocation2 + $0x10] sm:$0x3] %v553_v2  ;;  %v28_v10 = vld [vmem:[%s991_s0 + $0x18] sm:$0x3]  ;;  %v804_v12 = vld [vmem:[%s991_s0] sm:$0xff]  ;;  %v809_v13 = vld [vmem:[%s991_s0 + $0x8] sm:$0xff] }
   0x4   :  { %612 = vrot.lane.b32.xlu1 %v611_v3, %s748_s17  ;;  %622 = vrot.lane.b32.xlu2 %v606_v6, %s749_s18  ;;  %41 = vst [vmem:[#allocation2 + $0x38] sm:$0x3] %v554_v5  ;;  %v636_v14 = vpack.i.bf16 %v804_v12, %v747_v1  ;;  %v651_v18 = vpack.i.bf16 0.0, %v809_v13  ;;  %vm316_vm3 = vcmask 523264  }
   0x5   :  { %18 = vst [vmem:[#allocation2 + $0x48] sm:$0xff] %v747_v1 }
   0x6   :  { %19 = vst [vmem:[#allocation2 + $0x40] sm:$0xff] %v747_v1 }
   0x7   :  { %31 = vst [vmem:[#allocation2 + $0x48] sm:$0x3] %v27_v8 }
   0x8   :  { %32 = vst [vmem:[#allocation2 + $0x40] sm:$0x3] %v28_v10 }
   0xa   :  { %v786_v7 = vld [vmem:[#allocation2 + $0x10] sm:$0xff] }
   0xb   :  { %v791_v9 = vld [vmem:[#allocation2 + $0x38] sm:$0xff] }
   0xc   :  { %627 = vrot.lane.b32.xlu2 %v611_v3, %s749_s18  ;;  %v601_v11 = vpack.i.bf16 %v791_v9, %v786_v7 }
   0xe   :  { %602 = vrot.lane.b32.xlu0 %v601_v11, %s748_s17  ;;  %617 = vrot.lane.b32.xlu1 %v601_v11, %s749_s18  ;;  %v814_v15 = vld [vmem:[#allocation2 + $0x48] sm:$0xff] }
   0xf   :  { %v816_v16 = vld [vmem:[#allocation2 + $0x40] sm:$0xff] }
  0x10   :  { %v631_v17 = vpack.i.bf16 %v816_v16, %v814_v15 }
  0x14   :  { %642 = vrot.lane.b32.xlu2 %v601_v11, %s750_s27 }
  0x16   :  { %607 = vrot.lane.b32.xlu0 %v606_v6, %s748_s17  ;;  %637 = vrot.lane.b32.xlu1 %v636_v14, %s748_s17 }
  0x1c   :  { %657 = vrot.lane.b32.xlu2 %v611_v3, %s750_s27 }
  0x1e   :  { %632 = vrot.lane.b32.xlu0 %v631_v17, %s748_s17  ;;  %652 = vrot.lane.b32.xlu1 %v651_v18, %s748_s17 }
  0x24   :  { %672 = vrot.lane.b32.xlu2 %v651_v18, %s749_s18 }
  0x26   :  { %647 = vrot.lane.b32.xlu0 %v606_v6, %s750_s27  ;;  %667 = vrot.lane.b32.xlu1 %v636_v14, %s749_s18 }
  0x2c   :  { %687 = vrot.lane.b32.xlu2 %v651_v18, %s750_s27 }
  0x2e   :  { %662 = vrot.lane.b32.xlu0 %v631_v17, %s749_s18  ;;  %682 = vrot.lane.b32.xlu1 %v636_v14, %s750_s27 }
  0x36   :  { %677 = vrot.lane.b32.xlu0 %v631_v17, %s750_s27  ;;  %v277_v17 = vld [vmem:[%s992_s1] sm:$0xff] }
  0x5e   :  { %v623_v19 = vpop.permute.xlu2 %622 }
  0x5f   :  { %v625_v35 = vunpack.i.h.bf16 %v623_v19  ;;  %v624_v36 = vunpack.i.l.bf16 %v623_v19 }
  0x66   :  { %v628_v21 = vpop.permute.xlu2 %627 }
  0x67   :  { %v629_v37 = vunpack.i.l.bf16 %v628_v21  ;;  %v630_v43 = vunpack.i.h.bf16 %v628_v21 }
  0x69   :  { %v179_v46 = vsel %vm175_vm1, %v625_v35, %v629_v37  ;;  %v180_v52 = vsel %vm175_vm1, %v629_v37, %v630_v43 }
  0x6e   :  { %v643_v27 = vpop.permute.xlu2 %642 }
  0x6f   :  { %v645_v38 = vunpack.i.h.bf16 %v643_v27  ;;  %v644_v42 = vunpack.i.l.bf16 %v643_v27 }
  0x71   :  { %v120_v49 = vsel %vm110_vm2, %v644_v42, %v645_v38 }
  0x76   :  { %v613_v20 = vpop.permute.xlu1 %612  ;;  %v658_v58 = vpop.permute.xlu2 %657 }
  0x77   :  { %v615_v28 = vunpack.i.h.bf16 %v613_v20  ;;  %v614_v31 = vunpack.i.l.bf16 %v613_v20  ;;  %v660_v63 = vunpack.i.h.bf16 %v658_v58  ;;  %v659_v1 = vunpack.i.l.bf16 %v658_v58 }
  0x79   :  { %v245_v45 = vsel %vm240_vm0, %v614_v31, %v615_v28  ;;  %v115_v11 = vsel %vm110_vm2, %v659_v1, %v660_v63 }
  0x7e   :  { %v673_v14 = vpop.permute.xlu2 %672 }
  0x7f   :  { %v675_v18 = vunpack.i.h.bf16 %v673_v14 }
  0x80   :  { %v603_v22 = vpop.permute.xlu0 %602  ;;  %v618_v23 = vpop.permute.xlu1 %617 }
  0x81   :  { %v605_v24 = vunpack.i.h.bf16 %v603_v22  ;;  %v604_v25 = vunpack.i.l.bf16 %v603_v22  ;;  %v619_v32 = vunpack.i.l.bf16 %v618_v23  ;;  %v620_v39 = vunpack.i.h.bf16 %v618_v23 }
  0x82   :  { %v674_v23 = vunpack.i.l.bf16 %v673_v14 }
  0x83   :  { %v250_v26 = vsel %vm240_vm0, %v604_v25, %v605_v24  ;;  %v185_v44 = vsel %vm175_vm1, %v619_v32, %v620_v39  ;;  %v186_v47 = vsel %vm175_vm1, %v620_v39, %v624_v36  ;;  %v279_v39 = vld [vmem:[%s992_s1 + $0x10] sm:$0xff] }
  0x84   :  { %422 = vmatpush.msra.mxu2 %v250_v26  ;;  %v177_v26 = vsel %vm175_vm1, %v674_v23, %v675_v18 }
  0x86   :  { %v688_v27 = vpop.permute.xlu2 %687 }
  0x87   :  { %v690_v28 = vunpack.i.h.bf16 %v688_v27 }
  0x88   :  { %v608_v29 = vpop.permute.xlu0 %607  ;;  %v638_v30 = vpop.permute.xlu1 %637 }
  0x89   :  { %v610_v33 = vunpack.i.h.bf16 %v608_v29  ;;  %v609_v34 = vunpack.i.l.bf16 %v608_v29  ;;  %v639_v48 = vunpack.i.l.bf16 %v638_v30  ;;  %v640_v51 = vunpack.i.h.bf16 %v638_v30 }
  0x8b   :  { %v244_v40 = vsel %vm240_vm0, %v610_v33, %v614_v31  ;;  %v251_v41 = vsel %vm240_vm0, %v605_v24, %v609_v34  ;;  %v689_v33 = vunpack.i.l.bf16 %v688_v27 }
  0x8c   :  { %423 = vmatpush.msra.mxu2 %v244_v40  ;;  %460 = vmatpush.msra.mxu3 %v251_v41  ;;  %v280_v40 = vld [vmem:[%s992_s1 + $0x18] sm:$0xff] }
  0x8d   :  { %v112_v37 = vsel %vm110_vm2, %v689_v33, %v690_v28 }
  0x8e   :  { %424 = vmatpush.msra.mxu2 %v185_v44  ;;  %461 = vmatpush.msra.mxu3 %v245_v45 }
  0x90   :  { %425 = vmatpush.msra.mxu2 %v179_v46  ;;  %462 = vmatpush.msra.mxu3 %v186_v47  ;;  %v633_v50 = vpop.permute.xlu0 %632  ;;  %v653_v53 = vpop.permute.xlu1 %652 }
  0x91   :  { %v635_v54 = vunpack.i.h.bf16 %v633_v50  ;;  %v634_v55 = vunpack.i.l.bf16 %v633_v50  ;;  %v655_v56 = vunpack.i.h.bf16 %v653_v53  ;;  %v654_v57 = vunpack.i.l.bf16 %v653_v53 }
  0x92   :  { %463 = vmatpush.msra.mxu3 %v180_v52  ;;  %426 = vmatpush.msra.mxu2 %v120_v49 }
  0x93   :  { %v247_v59 = vsel %vm240_vm0, %v634_v55, %v635_v54  ;;  %v248_v60 = vsel %vm240_vm0, %v635_v54, %v639_v48  ;;  %v242_v61 = vsel %vm240_vm0, %v654_v57, %v655_v56  ;;  %v241_v62 = vsel %vm240_vm0, %v640_v51, %v654_v57 }
  0x94   :  { %346 = vmatpush.msra.mxu0 %v247_v59  ;;  %384 = vmatpush.msra.mxu1 %v248_v60 }
  0x96   :  { %347 = vmatpush.msra.mxu0 %v241_v62  ;;  %385 = vmatpush.msra.mxu1 %v242_v61 }
  0x98   :  { %v648_v2 = vpop.permute.xlu0 %647  ;;  %v668_v6 = vpop.permute.xlu1 %667 }
  0x99   :  { %v650_v3 = vunpack.i.h.bf16 %v648_v2  ;;  %v649_v5 = vunpack.i.l.bf16 %v648_v2  ;;  %v669_v19 = vunpack.i.l.bf16 %v668_v6  ;;  %v670_v24 = vunpack.i.h.bf16 %v668_v6 }
  0x9b   :  { %v114_v8 = vsel %vm110_vm2, %v650_v3, %v659_v1  ;;  %v121_v10 = vsel %vm110_vm2, %v645_v38, %v649_v5 }
  0x9c   :  { %427 = vmatpush.msra.mxu2 %v114_v8  ;;  %464 = vmatpush.msra.mxu3 %v121_v10 }
  0x9e   :  { %465 = vmatpush.msra.mxu3 %v115_v11  ;;  %428 = vmatpush.msra.mxu2 %v786_v7 }
  0xa0   :  { %v663_v20 = vpop.permute.xlu0 %662  ;;  %466 = vmatpush.msra.mxu3 %v791_v9  ;;  %429 = vmatpush.msra.mxu2 %v778_v4  ;;  %v683_v9 = vpop.permute.xlu1 %682  ;;  %v176_v4 = vsel %vm175_vm1, %v670_v24, %v674_v23 }
  0xa1   :  { %v665_v21 = vunpack.i.h.bf16 %v663_v20  ;;  %v664_v22 = vunpack.i.l.bf16 %v663_v20  ;;  %569 = vmatmul.msk.f32.vlgmr.msra.gmra.mxu2 %vm316_vm3, %v277_v17  ;;  %v684_v29 = vunpack.i.l.bf16 %v683_v9  ;;  %v685_v34 = vunpack.i.h.bf16 %v683_v9 }
  0xa2   :  { %467 = vmatpush.msra.mxu3 %v769_v0  ;;  %v278_v0 = vld [vmem:[%s992_s1 + $0x8] sm:$0xff] }
  0xa3   :  { %v182_v7 = vsel %vm175_vm1, %v664_v22, %v665_v21  ;;  %v183_v25 = vsel %vm175_vm1, %v665_v21, %v669_v19  ;;  %576 = vmatmul.msk.f32.vlgmr.msra.gmra.mxu3 %vm316_vm3, %v277_v17  ;;  %v111_v38 = vsel %vm110_vm2, %v685_v34, %v689_v33 }
  0xa4   :  { %348 = vmatpush.msra.mxu0 %v182_v7  ;;  %386 = vmatpush.msra.mxu1 %v183_v25 }
  0xa6   :  { %349 = vmatpush.msra.mxu0 %v176_v4  ;;  %387 = vmatpush.msra.mxu1 %v177_v26 }
  0xa8   :  { %v678_v30 = vpop.permute.xlu0 %677 }
  0xa9   :  { %v680_v31 = vunpack.i.h.bf16 %v678_v30  ;;  %v679_v32 = vunpack.i.l.bf16 %v678_v30  ;;  %570 = vmatmul.msk.f32.gmra.mxu2 %vm316_vm3, %v278_v0 }
  0xab   :  { %v117_v35 = vsel %vm110_vm2, %v679_v32, %v680_v31  ;;  %v118_v36 = vsel %vm110_vm2, %v680_v31, %v684_v29  ;;  %577 = vmatmul.msk.f32.gmra.mxu3 %vm316_vm3, %v278_v0 }
  0xac   :  { %350 = vmatpush.msra.mxu0 %v117_v35  ;;  %388 = vmatpush.msra.mxu1 %v118_v36 }
  0xae   :  { %351 = vmatpush.msra.mxu0 %v111_v38  ;;  %389 = vmatpush.msra.mxu1 %v112_v37 }
  0xb0   :  { %352 = vmatpush.msra.mxu0 %v814_v15  ;;  %390 = vmatpush.msra.mxu1 %v816_v16  ;;  %v283_v15 = vld [vmem:[%s992_s1 + $0x30] sm:$0xff] }
  0xb1   :  { %571 = vmatmul.msk.f32.gmra.mxu2 %vm316_vm3, %v279_v39 }
  0xb2   :  { %353 = vmatpush.msra.mxu0 %v804_v12  ;;  %391 = vmatpush.msra.mxu1 %v809_v13  ;;  %v281_v12 = vld [vmem:[%s992_s1 + $0x20] sm:$0xff]  ;;  %v282_v13 = vld [vmem:[%s992_s1 + $0x28] sm:$0xff] }
  0xb3   :  { %555 = vmatmul.msk.f32.vlgmr.msra.gmra.mxu0 %vm316_vm3, %v277_v17  ;;  %562 = vmatmul.msk.f32.vlgmr.msra.gmra.mxu1 %vm316_vm3, %v277_v17 }
  0xb4   :  { %578 = vmatmul.msk.f32.gmra.mxu3 %vm316_vm3, %v279_v39 }
  0xb9   :  { %572 = vmatmul.msk.f32.gmra.mxu2 %vm316_vm3, %v280_v40 }
  0xbb   :  { %556 = vmatmul.msk.f32.gmra.mxu0 %vm316_vm3, %v278_v0  ;;  %563 = vmatmul.msk.f32.gmra.mxu1 %vm316_vm3, %v278_v0 }
  0xbc   :  { %579 = vmatmul.msk.f32.gmra.mxu3 %vm316_vm3, %v280_v40 }
  0xc1   :  { %573 = vmatmul.msk.f32.gmra.mxu2 %vm316_vm3, %v281_v12 }
  0xc3   :  { %557 = vmatmul.msk.f32.gmra.mxu0 %vm316_vm3, %v279_v39  ;;  %564 = vmatmul.msk.f32.gmra.mxu1 %vm316_vm3, %v279_v39 }
  0xc4   :  { %580 = vmatmul.msk.f32.gmra.mxu3 %vm316_vm3, %v281_v12 }
  0xc9   :  { %574 = vmatmul.msk.f32.gmra.mxu2 %vm316_vm3, %v282_v13 }
  0xcb   :  { %558 = vmatmul.msk.f32.gmra.mxu0 %vm316_vm3, %v280_v40  ;;  %565 = vmatmul.msk.f32.gmra.mxu1 %vm316_vm3, %v280_v40 }
  0xcc   :  { %581 = vmatmul.msk.f32.gmra.mxu3 %vm316_vm3, %v282_v13 }
  0xd1   :  { %575 = vmatmul.msk.f32.gmra.mxu2 %vm316_vm3, %v283_v15 }
  0xd3   :  { %559 = vmatmul.msk.f32.gmra.mxu0 %vm316_vm3, %v281_v12  ;;  %566 = vmatmul.msk.f32.gmra.mxu1 %vm316_vm3, %v281_v12 }
  0xd4   :  { %582 = vmatmul.msk.f32.gmra.mxu3 %vm316_vm3, %v283_v15 }
  0xdb   :  { %560 = vmatmul.msk.f32.gmra.mxu0 %vm316_vm3, %v282_v13  ;;  %567 = vmatmul.msk.f32.gmra.mxu1 %vm316_vm3, %v282_v13 }
  0xe3   :  { %561 = vmatmul.msk.f32.gmra.mxu0 %vm316_vm3, %v283_v15  ;;  %568 = vmatmul.msk.f32.gmra.mxu1 %vm316_vm3, %v283_v15 }
 0x124   :  { %v431_v16 = vpop.f32.mrf.mxu2 }
 0x125   :  { %691 = vtanh.f32 %v431_v16 }
 0x126   :  { %v469_v41 = vpop.f32.mrf.mxu3 }
 0x127   :  { %693 = vtanh.f32 %v469_v41 }
 0x12b   :  { %v692_v42 = vpop.eup %691 }
 0x12c   :  { %583 = vst [vmem:[%s993_s2 + $0x70] sm:$0xff] %v692_v42  ;;  %v434_v43 = vpop.f32.mrf.mxu2 }
 0x12d   :  { %v694_v44 = vpop.eup %693  ;;  %695 = vtanh.f32 %v434_v43 }
 0x12e   :  { %584 = vst [vmem:[%s993_s2 + $0x78] sm:$0xff] %v694_v44  ;;  %v472_v45 = vpop.f32.mrf.mxu3 }
 0x12f   :  { %697 = vtanh.f32 %v472_v45 }
 0x130   :  { %v355_v46 = vpop.f32.mrf.mxu0  ;;  %v393_v47 = vpop.f32.mrf.mxu1 }
 0x131   :  { %699 = vtanh.f32 %v355_v46 }
 0x132   :  { %701 = vtanh.f32 %v393_v47 }
 0x133   :  { %v696_v48 = vpop.eup %695 }
 0x134   :  { %585 = vst [vmem:[%s993_s2 + $0x80] sm:$0xff] %v696_v48  ;;  %v437_v49 = vpop.f32.mrf.mxu2 }
 0x135   :  { %v698_v50 = vpop.eup %697  ;;  %703 = vtanh.f32 %v437_v49 }
 0x136   :  { %586 = vst [vmem:[%s993_s2 + $0x88] sm:$0xff] %v698_v50 }
 0x137   :  { %v700_v51 = vpop.eup %699  ;;  %v475_v52 = vpop.f32.mrf.mxu3 }
 0x138   :  { %v702_v53 = vpop.eup %701  ;;  %504 = vst [vmem:[%s993_s2] sm:$0xff] %v700_v51  ;;  %v358_v54 = vpop.f32.mrf.mxu0  ;;  %705 = vtanh.f32 %v475_v52 }
 0x139   :  { %v396_v55 = vpop.f32.mrf.mxu1  ;;  %505 = vst [vmem:[%s993_s2 + $0x8] sm:$0xff] %v702_v53  ;;  %707 = vtanh.f32 %v358_v54 }
 0x13a   :  { %709 = vtanh.f32 %v396_v55 }
 0x13b   :  { %v704_v56 = vpop.eup %703 }
 0x13c   :  { %587 = vst [vmem:[%s993_s2 + $0x90] sm:$0xff] %v704_v56  ;;  %v440_v57 = vpop.f32.mrf.mxu2 }
 0x13d   :  { %711 = vtanh.f32 %v440_v57 }
 0x13e   :  { %v706_v58 = vpop.eup %705 }
 0x13f   :  { %v708_v59 = vpop.eup %707  ;;  %588 = vst [vmem:[%s993_s2 + $0x98] sm:$0xff] %v706_v58  ;;  %v478_v60 = vpop.f32.mrf.mxu3 }
 0x140   :  { %v710_v61 = vpop.eup %709  ;;  %506 = vst [vmem:[%s993_s2 + $0x10] sm:$0xff] %v708_v59  ;;  %v361_v62 = vpop.f32.mrf.mxu0  ;;  %713 = vtanh.f32 %v478_v60 }
 0x141   :  { %v399_v63 = vpop.f32.mrf.mxu1  ;;  %507 = vst [vmem:[%s993_s2 + $0x18] sm:$0xff] %v710_v61  ;;  %715 = vtanh.f32 %v361_v62 }
 0x142   :  { %717 = vtanh.f32 %v399_v63 }
 0x143   :  { %v712_v1 = vpop.eup %711 }
 0x144   :  { %589 = vst [vmem:[%s993_s2 + $0xa0] sm:$0xff] %v712_v1  ;;  %v443_v2 = vpop.f32.mrf.mxu2 }
 0x145   :  { %719 = vtanh.f32 %v443_v2 }
 0x146   :  { %v714_v3 = vpop.eup %713 }
 0x147   :  { %v716_v5 = vpop.eup %715  ;;  %590 = vst [vmem:[%s993_s2 + $0xa8] sm:$0xff] %v714_v3  ;;  %v481_v6 = vpop.f32.mrf.mxu3 }
 0x148   :  { %v718_v8 = vpop.eup %717  ;;  %508 = vst [vmem:[%s993_s2 + $0x20] sm:$0xff] %v716_v5  ;;  %v364_v10 = vpop.f32.mrf.mxu0  ;;  %721 = vtanh.f32 %v481_v6 }
 0x149   :  { %v402_v11 = vpop.f32.mrf.mxu1  ;;  %509 = vst [vmem:[%s993_s2 + $0x28] sm:$0xff] %v718_v8  ;;  %723 = vtanh.f32 %v364_v10 }
 0x14a   :  { %725 = vtanh.f32 %v402_v11 }
 0x14b   :  { %v720_v14 = vpop.eup %719 }
 0x14c   :  { %591 = vst [vmem:[%s993_s2 + $0xb0] sm:$0xff] %v720_v14  ;;  %v446_v17 = vpop.f32.mrf.mxu2 }
 0x14d   :  { %727 = vtanh.f32 %v446_v17 }
 0x14e   :  { %v722_v18 = vpop.eup %721 }
 0x14f   :  { %v724_v19 = vpop.eup %723  ;;  %592 = vst [vmem:[%s993_s2 + $0xb8] sm:$0xff] %v722_v18  ;;  %v484_v20 = vpop.f32.mrf.mxu3 }
 0x150   :  { %v726_v21 = vpop.eup %725  ;;  %510 = vst [vmem:[%s993_s2 + $0x30] sm:$0xff] %v724_v19  ;;  %v367_v22 = vpop.f32.mrf.mxu0  ;;  %729 = vtanh.f32 %v484_v20 }
 0x151   :  { %v405_v23 = vpop.f32.mrf.mxu1  ;;  %511 = vst [vmem:[%s993_s2 + $0x38] sm:$0xff] %v726_v21  ;;  %731 = vtanh.f32 %v367_v22 }
 0x152   :  { %733 = vtanh.f32 %v405_v23 }
 0x153   :  { %v728_v24 = vpop.eup %727 }
 0x154   :  { %593 = vst [vmem:[%s993_s2 + $0xc0] sm:$0xff] %v728_v24  ;;  %v449_v7 = vpop.f32.mrf.mxu2 }
 0x155   :  { %735 = vtanh.f32 %v449_v7 }
 0x156   :  { %v730_v25 = vpop.eup %729 }
 0x157   :  { %v732_v26 = vpop.eup %731  ;;  %594 = vst [vmem:[%s993_s2 + $0xc8] sm:$0xff] %v730_v25  ;;  %v487_v9 = vpop.f32.mrf.mxu3 }
 0x158   :  { %v734_v4 = vpop.eup %733  ;;  %512 = vst [vmem:[%s993_s2 + $0x40] sm:$0xff] %v732_v26  ;;  %v370_v27 = vpop.f32.mrf.mxu0  ;;  %737 = vtanh.f32 %v487_v9 }
 0x159   :  { %v408_v0 = vpop.f32.mrf.mxu1  ;;  %513 = vst [vmem:[%s993_s2 + $0x48] sm:$0xff] %v734_v4  ;;  %739 = vtanh.f32 %v370_v27 }
 0x15a   :  { %741 = vtanh.f32 %v408_v0 }
 0x15b   :  { %v736_v28 = vpop.eup %735 }
 0x15c   :  { %595 = vst [vmem:[%s993_s2 + $0xd0] sm:$0xff] %v736_v28 }
 0x15e   :  { %v738_v29 = vpop.eup %737 }
 0x15f   :  { %v740_v30 = vpop.eup %739  ;;  %596 = vst [vmem:[%s993_s2 + $0xd8] sm:$0xff] %v738_v29 }
 0x160   :  { %v742_v31 = vpop.eup %741  ;;  %514 = vst [vmem:[%s993_s2 + $0x50] sm:$0xff] %v740_v30  ;;  %v373_v32 = vpop.f32.mrf.mxu0 }
 0x161   :  { %v411_v33 = vpop.f32.mrf.mxu1  ;;  %515 = vst [vmem:[%s993_s2 + $0x58] sm:$0xff] %v742_v31  ;;  %743 = vtanh.f32 %v373_v32 }
 0x162   :  { %745 = vtanh.f32 %v411_v33 }
 0x167   :  { %v744_v34 = vpop.eup %743 }
 0x168   :  { %v746_v35 = vpop.eup %745  ;;  %516 = vst [vmem:[%s993_s2 + $0x60] sm:$0xff] %v744_v34 }
 0x169   :  { %517 = vst [vmem:[%s993_s2 + $0x68] sm:$0xff] %v746_v35 }

</bundles_post_ra>
